<compile_context>
chip_gen: v7x
topology: tpu7x:2x2x1
jax: 0.10.0
libtpu: 0.0.40
codegen_flags: <defaults>
</compile_context>

<pallas_src>
import math
import functools

import jax
import jax.numpy as jnp
from jax import lax
from jax.experimental import pallas as pl
from jax.experimental.pallas import tpu as pltpu


# ---------------------------------------------------------------------------
# Hardware-aware sizing helpers
# ---------------------------------------------------------------------------

@functools.lru_cache(maxsize=None)
def _vmem_limit_bytes():
    """75% of physical VMEM (64 MiB fallback covers v7x / CPU-interpret)."""
    cap = 64 * 1024 * 1024
    try:
        info = pltpu.get_tpu_info()
        for name in ("vmem_capacity_bytes", "vmem_size_bytes", "vmem_bytes"):
            val = getattr(info, name, None)
            if val:
                cap = int(val)
                break
    except Exception:
        pass
    return (cap * 3) // 4


def _attn_q_tile_target():
    # Bigger query tiles on 128-MiB-VMEM parts (v5e/v6e), smaller on v7x.
    return 1024 if _vmem_limit_bytes() >= 80 * 1024 * 1024 else 256


def _pick_tile(total, target, align=8):
    """Largest divisor of `total` that is <= target and a multiple of `align`;
    falls back to `total` (a full-extent block is always legal)."""
    if total <= target:
        return total
    t = (target // align) * align
    while t >= align:
        if total % t == 0:
            return t
        t -= align
    return total


# ---------------------------------------------------------------------------
# Attention kernel: heads looped in-kernel, output written in concat layout
# ---------------------------------------------------------------------------

def _attention_body(q_ref, k_ref, v_ref, m_ref, o_ref, *, scale, n_head,
                    approx_recip, bf16_matmul):
    # q_ref / o_ref: (1, TQ, d_model); k_ref / v_ref: (1, S, d_model)
    # m_ref: None or (1, Hm, TQm, S) with Hm in {1, n_head}, TQm in {1, TQ}
    q = q_ref[0] * scale                       # scale Q once (cheaper than scores)
    k = k_ref[0]
    v = v_ref[0]
    if bf16_matmul:
        q = q.astype(jnp.bfloat16)
        k = k.astype(jnp.bfloat16)
        v = v.astype(jnp.bfloat16)

    d_model = q.shape[-1]
    d_head = d_model // n_head

    for h in range(n_head):                    # static unroll over heads
        lo = h * d_head
        qh = q[:, lo:lo + d_head]              # (TQ, Dh)   static lane slice
        kh = k[:, lo:lo + d_head]              # (S,  Dh)
        vh = v[:, lo:lo + d_head]              # (S,  Dh)

        # Q @ K^T on the MXU, contracting the head dim (no materialized transpose).
        scores = lax.dot_general(qh, kh, (((1,), (1,)), ((), ())),
                                 preferred_element_type=jnp.float32)   # (TQ, S)

        if m_ref is not None:
            hm = h if m_ref.shape[1] > 1 else 0
            mh = m_ref[0, hm]                  # (TQm, S); broadcasts over queries
            scores = jnp.where(mh == 0.0, -1000000000.0, scores)

        # numerically stable softmax; normalization deferred past the PV matmul
        mx = jnp.max(scores, axis=-1, keepdims=True)
        e = jnp.exp(scores - mx)
        denom = jnp.sum(e, axis=-1, keepdims=True)
        out_h = lax.dot_general(e.astype(vh.dtype), vh, (((1,), (0,)), ((), ())),
                                preferred_element_type=jnp.float32)    # (TQ, Dh)
        out_h = out_h * pl.reciprocal(denom, approx=approx_recip)

        # write directly into the concat ([.., d_model]) output block
        o_ref[0, :, lo:lo + d_head] = out_h.astype(o_ref.dtype)


def _attn_kernel(q_ref, k_ref, v_ref, o_ref, *, scale, n_head,
                 approx_recip, bf16_matmul):
    _attention_body(q_ref, k_ref, v_ref, None, o_ref, scale=scale, n_head=n_head,
                    approx_recip=approx_recip, bf16_matmul=bf16_matmul)


def _attn_kernel_masked(q_ref, k_ref, v_ref, m_ref, o_ref, *, scale, n_head,
                        approx_recip, bf16_matmul):
    _attention_body(q_ref, k_ref, v_ref, m_ref, o_ref, scale=scale, n_head=n_head,
                    approx_recip=approx_recip, bf16_matmul=bf16_matmul)


def mha_attention(q, k, v, n_head, mask=None, *, approx_recip=False,
                  bf16_matmul=False):
    """Multi-head scaled-dot-product attention on [B, S, d_model] inputs.

    Head split + concat are done inside the kernel; the (S,S) attention
    weights never touch HBM.  Returns [B, S, d_model].
    """
    B, S, d_model = q.shape
    assert k.shape == (B, S, d_model) and v.shape == (B, S, d_model)
    assert d_model % n_head == 0
    d_head = d_model // n_head
    scale = 1.0 / math.sqrt(d_head)

    TQ = _pick_tile(S, _attn_q_tile_target())
    nq = S // TQ
    grid = (B, nq)

    q_spec = pl.BlockSpec((1, TQ, d_model), lambda b, i: (b, i, 0))
    kv_spec = pl.BlockSpec((1, S, d_model), lambda b, i: (b, 0, 0))   # resident across q tiles
    o_spec = pl.BlockSpec((1, TQ, d_model), lambda b, i: (b, i, 0))

    cparams = pltpu.CompilerParams(
        dimension_semantics=("parallel", "parallel"),
        vmem_limit_bytes=_vmem_limit_bytes())

    flops = 4 * B * S * S * d_model                 # QK^T + PV
    transcendentals = B * n_head * S * S            # exp
    bytes_accessed = 4 * (4 * B * S * d_model)      # q, k, v in + o out (f32)

    out_shape = jax.ShapeDtypeStruct((B, S, d_model), q.dtype)

    if mask is None:
        kern = functools.partial(_attn_kernel, scale=scale, n_head=n_head,
                                 approx_recip=approx_recip, bf16_matmul=bf16_matmul)
        return pl.pallas_call(
            kern, out_shape=out_shape, grid=grid,
            in_specs=[q_spec, kv_spec, kv_spec],
            out_specs=o_spec, compiler_params=cparams,
            cost_estimate=pl.CostEstimate(flops=flops,
                                          transcendentals=transcendentals,
                                          bytes_accessed=bytes_accessed),
        )(q, k, v)

    # ---- masked path: mask stays un-broadcast in HBM ----------------------
    m = jnp.asarray(mask)
    while m.ndim < 4:
        m = m[None]
    Bm, Hm, Sqm, Skm = m.shape
    assert Bm in (1, B) and Hm in (1, n_head) and Sqm in (1, S) and Skm in (1, S), \
        "mask must be broadcastable to (B, n_head, S, S)"
    if Skm != S:                                    # rare: broadcast key axis only
        m = jnp.broadcast_to(m, (Bm, Hm, Sqm, S))
    # float32 keeps non-binary mask values exact and avoids int8 relayouts.
    m = m.astype(jnp.float32)

    TQm = TQ if Sqm == S else 1

    def m_index(b, i, _Bm=Bm, _Sqm=Sqm):
        return (b if _Bm > 1 else 0, 0, i if _Sqm > 1 else 0, 0)

    m_spec = pl.BlockSpec((1, Hm, TQm, S), m_index)
    bytes_accessed += 4 * Bm * Hm * max(Sqm, 1) * S

    kern = functools.partial(_attn_kernel_masked, scale=scale, n_head=n_head,
                             approx_recip=approx_recip, bf16_matmul=bf16_matmul)
    return pl.pallas_call(
        kern, out_shape=out_shape, grid=grid,
        in_specs=[q_spec, kv_spec, kv_spec, m_spec],
        out_specs=o_spec, compiler_params=cparams,
        cost_estimate=pl.CostEstimate(flops=flops,
                                      transcendentals=transcendentals,
                                      bytes_accessed=bytes_accessed),
    )(q, k, v, m)


# ---------------------------------------------------------------------------
# Linear (nn.Linear) kernel: y = x @ W + b   (W stored [d_in, d_out])
# ---------------------------------------------------------------------------

def _linear_kernel(x_ref, w_ref, b_ref, o_ref, *, bf16_matmul):
    x = x_ref[...]
    w = w_ref[...]
    if bf16_matmul:
        x = x.astype(jnp.bfloat16)
        w = w.astype(jnp.bfloat16)
    acc = jnp.dot(x, w, preferred_element_type=jnp.float32)
    o_ref[...] = (acc + b_ref[...]).astype(o_ref.dtype)


def linear(x, w, b, *, bf16_matmul=False):
    N, d_in = x.shape
    d_in2, d_out = w.shape
    assert d_in == d_in2 and b.shape == (d_out,)
    TN = _pick_tile(N, 512)
    TO = _pick_tile(d_out, 512, align=128)
    ni, nj = N // TN, d_out // TO
    b2 = b.reshape(1, d_out)

    kern = functools.partial(_linear_kernel, bf16_matmul=bf16_matmul)
    cost = pl.CostEstimate(
        flops=2 * N * d_in * d_out, transcendentals=0,
        bytes_accessed=4 * (N * d_in + d_in * d_out + N * d_out + d_out))
    cparams = pltpu.CompilerParams(
        dimension_semantics=("parallel", "parallel"),
        vmem_limit_bytes=_vmem_limit_bytes())

    # Grid order: pay the cheaper of (re-stream W ni times) vs (re-stream X nj times).
    if ni * d_in * d_out <= nj * N * d_in:
        grid = (ni, nj)
        x_spec = pl.BlockSpec((TN, d_in), lambda i, j: (i, 0))
        w_spec = pl.BlockSpec((d_in, TO), lambda i, j: (0, j))
        b_spec = pl.BlockSpec((1, TO), lambda i, j: (0, j))
        o_spec = pl.BlockSpec((TN, TO), lambda i, j: (i, j))
    else:
        grid = (nj, ni)
        x_spec = pl.BlockSpec((TN, d_in), lambda j, i: (i, 0))
        w_spec = pl.BlockSpec((d_in, TO), lambda j, i: (0, j))
        b_spec = pl.BlockSpec((1, TO), lambda j, i: (0, j))
        o_spec = pl.BlockSpec((TN, TO), lambda j, i: (i, j))

    return pl.pallas_call(
        kern, out_shape=jax.ShapeDtypeStruct((N, d_out), x.dtype),
        grid=grid, in_specs=[x_spec, w_spec, b_spec], out_specs=o_spec,
        compiler_params=cparams, cost_estimate=cost,
    )(x, w, b2)


# ---------------------------------------------------------------------------
# Fused QKV projection (self-attention): activations read from HBM once
# ---------------------------------------------------------------------------

def _qkv_proj_kernel(x_ref, w_ref, b_ref, oq_ref, ok_ref, ov_ref, *, bf16_matmul):
    x = x_ref[...]
    if bf16_matmul:
        x = x.astype(jnp.bfloat16)
    outs = (oq_ref, ok_ref, ov_ref)
    for t in range(3):
        w = w_ref[t]
        if bf16_matmul:
            w = w.astype(jnp.bfloat16)
        acc = jnp.dot(x, w, preferred_element_type=jnp.float32)
        outs[t][...] = (acc + b_ref[t]).astype(outs[t].dtype)


def qkv_projection(x, w_qkv, b_qkv, *, bf16_matmul=False):
    """x: (N, d_in); w_qkv: (3, d_in, d_out); b_qkv: (3, 1, d_out).
    Returns (q, k, v), each (N, d_out).  One pallas_call, x read once."""
    N, d_in = x.shape
    three, d_in2, d_out = w_qkv.shape
    assert three == 3 and d_in2 == d_in
    TN = _pick_tile(N, 512)

    kern = functools.partial(_qkv_proj_kernel, bf16_matmul=bf16_matmul)
    out_sd = jax.ShapeDtypeStruct((N, d_out), x.dtype)
    out_spec = pl.BlockSpec((TN, d_out), lambda i: (i, 0))
    cost = pl.CostEstimate(
        flops=6 * N * d_in * d_out, transcendentals=0,
        bytes_accessed=4 * (N * d_in + 3 * d_in * d_out + 3 * N * d_out))

    return pl.pallas_call(
        kern, out_shape=(out_sd, out_sd, out_sd), grid=(N // TN,),
        in_specs=[pl.BlockSpec((TN, d_in), lambda i: (i, 0)),
                  pl.BlockSpec((3, d_in, d_out), lambda i: (0, 0, 0)),
                  pl.BlockSpec((3, 1, d_out), lambda i: (0, 0, 0))],
        out_specs=(out_spec, out_spec, out_spec),
        compiler_params=pltpu.CompilerParams(
            dimension_semantics=("parallel",),
            vmem_limit_bytes=_vmem_limit_bytes()),
        cost_estimate=cost,
    )(x, w_qkv, b_qkv)


# ---------------------------------------------------------------------------
# MultiHeadAttention.forward
# ---------------------------------------------------------------------------

def multi_head_attention(q, k, v, params, n_head, mask=None, *,
                         approx_recip=False, bf16_matmul=False):
    B, S, d_model = q.shape
    assert d_model % n_head == 0

    if (q is k) and (k is v):
        # Self-attention: fused projection (one GEMM kernel, x read once).
        w_qkv = jnp.stack([params["w_q"], params["w_k"], params["w_v"]])
        b_qkv = jnp.stack([params["b_q"], params["b_k"], params["b_v"]])[:, None, :]
        qp, kp, vp = qkv_projection(q.reshape(B * S, d_model), w_qkv, b_qkv,
                                    bf16_matmul=bf16_matmul)
    else:
        qp = linear(q.reshape(B * S, d_model), params["w_q"], params["b_q"],
                    bf16_matmul=bf16_matmul)
        kp = linear(k.reshape(B * S, d_model), params["w_k"], params["b_k"],
                    bf16_matmul=bf16_matmul)
        vp = linear(v.reshape(B * S, d_model), params["w_v"], params["b_v"],
                    bf16_matmul=bf16_matmul)

    qp = qp.reshape(B, S, d_model)
    kp = kp.reshape(B, S, d_model)
    vp = vp.reshape(B, S, d_model)

    # Head split & concat are folded into the attention kernel (no HBM transposes).
    sa = mha_attention(qp, kp, vp, n_head, mask=mask,
                       approx_recip=approx_recip, bf16_matmul=bf16_matmul)

    out = linear(sa.reshape(B * S, d_model), params["w_fc"], params["b_fc"],
                 bf16_matmul=bf16_matmul)
    return out.reshape(B, S, d_model)


# ---------------------------------------------------------------------------
# Pure-JAX reference (mirrors the PyTorch module)
# ---------------------------------------------------------------------------

def _reference_mha(q, k, v, params, n_head, mask=None):
    B, S, d_model = q.shape
    d_head = d_model // n_head

    def lin(x, w, b):
        return jnp.dot(x, w, precision="highest") + b

    def split(x):
        return x.reshape(B, S, n_head, d_head).transpose(0, 2, 1, 3)

    qh = split(lin(q, params["w_q"], params["b_q"]))
    kh = split(lin(k, params["w_k"], params["b_k"]))
    vh = split(lin(v, params["w_v"], params["b_v"]))

    scores = jnp.einsum("bhqd,bhkd->bhqk", qh, kh,
                        precision="highest") / math.sqrt(d_head)
    if mask is not None:
        scores = jnp.where(mask == 0, -1000000000.0, scores)
    attn = jax.nn.softmax(scores, axis=-1)
    sa = jnp.einsum("bhqk,bhkd->bhqd", attn, vh, precision="highest")
    concat = sa.transpose(0, 2, 1, 3).reshape(B, S, d_model)
    return lin(concat, params["w_fc"], params["b_fc"])


if __name__ == "__main__":
    B, S, d_model, n_head = 2, 8, 32, 4

    key = jax.random.PRNGKey(0)
    keys = jax.random.split(key, 11)

    q = jax.random.normal(keys[0], (B, S, d_model), dtype=jnp.float32)
    k = jax.random.normal(keys[1], (B, S, d_model), dtype=jnp.float32)
    v = jax.random.normal(keys[2], (B, S, d_model), dtype=jnp.float32)

    def init_linear(kw, kb, d_in, d_out):
        lim = 1.0 / math.sqrt(d_in)
        w = jax.random.uniform(kw, (d_in, d_out), jnp.float32, -lim, lim)
        bb = jax.random.uniform(kb, (d_out,), jnp.float32, -lim, lim)
        return w, bb

    params = {}
    params["w_q"], params["b_q"] = init_linear(keys[3], keys[4], d_model, d_model)
    params["w_k"], params["b_k"] = init_linear(keys[5], keys[6], d_model, d_model)
    params["w_v"], params["b_v"] = init_linear(keys[7], keys[8], d_model, d_model)
    params["w_fc"], params["b_fc"] = init_linear(keys[9], keys[10], d_model, d_model)

    def check(name, mask, self_attn=False):
        qq, kk, vv = (q, q, q) if self_attn else (q, k, v)
        out = jax.block_until_ready(
            multi_head_attention(qq, kk, vv, params, n_head, mask=mask))
        ref = _reference_mha(qq, kk, vv, params, n_head, mask=mask)
        assert out.shape == ref.shape, f"{name}: shape mismatch"
        assert jnp.allclose(out, ref, atol=1e-3, rtol=1e-3), f"{name}: value mismatch"

    # 1) cross-attention, no mask
    check("no-mask", None)

    # 2) shared causal mask [1, 1, S, S] (single shared mask block)
    causal = jnp.tril(jnp.ones((S, S), dtype=jnp.int32))[None, None]
    check("causal-mask", causal)

    # 3) per-batch key-padding mask [B, 1, 1, S] (kept un-broadcast in HBM)
    kp_mask = jnp.ones((B, 1, 1, S), dtype=jnp.int32).at[0, :, :, S - 3:].set(0)
    check("padding-mask", kp_mask)

    # 4) self-attention (fused QKV projection) with a per-head mask [1, H, S, S]
    per_head = jnp.tril(jnp.ones((n_head, S, S), dtype=jnp.int32))[None]
    per_head = per_head.at[:, 0].set(1)      # head 0 unmasked, other heads causal
    check("self-attn-per-head-mask", per_head, self_attn=True)

    print("KERNEL_OK")
</pallas_src>

<mosaic_0001>
module attributes {stable_mosaic.version = 11 : i64} {
  func.func @_linear_kernel(%arg0: i32, %arg1: i32, %arg2: memref<16x32xf32, #tpu.memory_space<vmem>>, %arg3: memref<32x32xf32, #tpu.memory_space<vmem>>, %arg4: memref<1x32xf32, #tpu.memory_space<vmem>>, %arg5: memref<16x32xf32, #tpu.memory_space<vmem>>) attributes {dimension_semantics = [#tpu.dimension_semantics<parallel>, #tpu.dimension_semantics<parallel>], iteration_bounds = array<i64: 1, 1>, scalar_prefetch = 0 : i64, scratch_operands = 0 : i64, tpu.core_type = #tpu.core_type<tc>, window_params = [{transform_indices = @transform_0, window_bounds = array<i64: 16, 32>}, {transform_indices = @transform_1, window_bounds = array<i64: 32, 32>}, {transform_indices = @transform_2, window_bounds = array<i64: 1, 32>}, {transform_indices = @transform_3, window_bounds = array<i64: 16, 32>}]} {
    %c0 = arith.constant 0 : index
    %c0_0 = arith.constant 0 : index
    %0 = vector.load %arg2[%c0, %c0_0] : memref<16x32xf32, #tpu.memory_space<vmem>>, vector<16x32xf32>
    %c0_1 = arith.constant 0 : index
    %c0_2 = arith.constant 0 : index
    %1 = vector.load %arg3[%c0_1, %c0_2] : memref<32x32xf32, #tpu.memory_space<vmem>>, vector<32x32xf32>
    %cst = arith.constant dense<0.000000e+00> : vector<16x32xf32>
    %2 = tpu.matmul %0, %1, %cst {dimension_numbers = #tpu.dot_dimension_numbers<[1], [0], [0], [1], [0, 0, 1, 1], [], []>} : vector<16x32xf32>, vector<32x32xf32>, vector<16x32xf32> -> vector<16x32xf32>
    %c0_3 = arith.constant 0 : index
    %c0_4 = arith.constant 0 : index
    %3 = vector.load %arg4[%c0_3, %c0_4] : memref<1x32xf32, #tpu.memory_space<vmem>>, vector<1x32xf32>
    %4 = vector.broadcast %3 : vector<1x32xf32> to vector<16x32xf32>
    %5 = arith.addf %2, %4 : vector<16x32xf32>
    %c0_5 = arith.constant 0 : index
    %c0_6 = arith.constant 0 : index
    %6 = vector.load %arg5[%c0_5, %c0_6] : memref<16x32xf32, #tpu.memory_space<vmem>>, vector<16x32xf32>
    tpu.vector_store %arg5[%c0_5, %c0_6], %5 {strides = array<i32>} : memref<16x32xf32, #tpu.memory_space<vmem>>, vector<16x32xf32>,
    return
  }
  func.func @transform_0(%arg0: i32, %arg1: i32) -> (i32, i32) {
    %c0_i32 = arith.constant 0 : i32
    %c0_i32_0 = arith.constant 0 : i32
    return %arg1, %c0_i32 : i32, i32
  }
  func.func @transform_1(%arg0: i32, %arg1: i32) -> (i32, i32) {
    %c0_i32 = arith.constant 0 : i32
    %c0_i32_0 = arith.constant 0 : i32
    return %c0_i32, %arg0 : i32, i32
  }
  func.func @transform_2(%arg0: i32, %arg1: i32) -> (i32, i32) {
    %c0_i32 = arith.constant 0 : i32
    %c0_i32_0 = arith.constant 0 : i32
    return %c0_i32, %arg0 : i32, i32
  }
  func.func @transform_3(%arg0: i32, %arg1: i32) -> (i32, i32) {
    %c0_i32 = arith.constant 0 : i32
    return %arg1, %arg0 : i32, i32
  }
}

</mosaic_0001>

<bundles_post_ra>
// kernel: tpu_custom_call.1
= control target key start
LH: loop header
LB: loop body
LE: loop exit
PB: predicated region body
PF: predicated region fallthrough
CT: control target
= control target key end

     0   :  { %8 = vsyncpa [#allocation3], 0  ;;  %s340_s0 = inlined_call_operand.hbm [shape: f32[16,32], index: 0, kind: input, shape index: {}]   ;;  %s341_s1 = inlined_call_operand.hbm [shape: f32[32,32], index: 1, kind: input, shape index: {}]   ;;  %s342_s2 = inlined_call_operand.vmem [shape: f32[1,32], index: 2, kind: input, shape index: {}]   ;;  %s343_s3 = inlined_call_operand.hbm [shape: f32[16,32], index: 3, kind: output, shape index: {}]  }
   0x1   :  { %9 = vsyncpa [#allocation6], 0 }
   0x2   :  { %10 = vsyncpa [#allocation4], 0  ;;  %s263_s12 = smov [#allocation2]   ;;  %s191_s16 = scalar_lea.hbm %s340_s0, 256 }
   0x3   :  { %s16_s13 = sshll.u32 %s263_s12, 4  ;;  %p192_p0 = scmp.ne.s32.totalorder %s340_s0, %s191_s16  ;;  %s17_s13 = int_to_ptr.vmem [resolvable:$true] %s16_s13 }
   0x4   :  { %p195_p1 = scmp.lt.u32.totalorder %s191_s16, %s340_s0 }
   0x6   :  { %p197_p2 = pnand %p195_p1, %p192_p0 }
   0x8   :  { %200 = shalt.err (!%p197_p2)
}
   0x9   :  { %s201_s21 = scalar_lea.vmem %s17_s13, 256  ;;  %p206_p4 = scmp.lt.s32.totalorder %s17_s13, %s17_s13 }
   0xa   :  { %p202_p3 = scmp.ne.s32.totalorder %s17_s13, %s201_s21  ;;  %p207_p5 = scmp.lt.s32.totalorder %s201_s21, %s201_s21 }
   0xc   :  { %p208_p6 = por %p207_p5, %p206_p4 }
   0xe   :  { %p209_p7 = pnand %p208_p6, %p202_p3 }
  0x10   :  { %212 = shalt.err (!%p209_p7)
}
  0x11   :  { %s264_s22 = smov 128   ;;  %s265_s23 = smov 8  }
  0x12   :  { %22 = dma.hbm_to_vmem [thread:$0]  %s340_s0, 256, %s17_s13, [#allocation3], %s264_s22, %s264_s22, %s265_s23  }
  0x13   :  { %s266_s26 = smov [#allocation5]   ;;  %s213_s30 = scalar_lea.hbm %s341_s1, 512 }
  0x14   :  { %s28_s27 = sshll.u32 %s266_s26, 4  ;;  %p214_p8 = scmp.ne.s32.totalorder %s341_s1, %s213_s30  ;;  %s29_s27 = int_to_ptr.vmem [resolvable:$true] %s28_s27 }
  0x15   :  { %p217_p9 = scmp.lt.u32.totalorder %s213_s30, %s341_s1 }
  0x17   :  { %p219_p10 = pnand %p217_p9, %p214_p8 }
  0x19   :  { %222 = shalt.err (!%p219_p10)
}
  0x1a   :  { %s223_s8 = scalar_lea.vmem %s29_s27, 512  ;;  %p228_p12 = scmp.lt.s32.totalorder %s29_s27, %s29_s27 }
  0x1b   :  { %p224_p11 = scmp.ne.s32.totalorder %s29_s27, %s223_s8  ;;  %p229_p13 = scmp.lt.s32.totalorder %s223_s8, %s223_s8 }
  0x1d   :  { %p230_p0 = por %p229_p13, %p228_p12 }
  0x1f   :  { %p231_p1 = pnand %p230_p0, %p224_p11 }
  0x21   :  { %234 = shalt.err (!%p231_p1)
}
  0x22   :  { %34 = dma.hbm_to_vmem [thread:$0]  %s341_s1, 512, %s29_s27, [#allocation6], %s264_s22, %s264_s22, %s265_s23  }
  0x23   :  { %257 = dma.done.wait [#allocation3], 256  }
  0x24   :  { %258 = vsyncadd [#allocation3], 4294967040 }
  0x25   :  { %259 = dma.done.wait [#allocation6], 512  }
  0x26   :  { %260 = vsyncadd [#allocation6], 4294966784  ;;  %vm56_vm0 = vcmask 261120   ;;  %v45_v0 = vld [vmem:[#allocation5] sm:$0xff]  ;;  %v46_v1 = vld [vmem:[#allocation5 + $0x8] sm:$0xff]  ;;  %s267_s11 = smov [#allocation7]  }
  0x27   :  { %v47_v2 = vld [vmem:[#allocation5 + $0x10] sm:$0xff]  ;;  %v178_v3 = vpack.c.bf16 %v46_v1, %v45_v0  ;;  %v48_v4 = vld [vmem:[#allocation5 + $0x18] sm:$0xff]  ;;  %s145_s12 = sshll.u32 %s267_s11, 4  ;;  %s146_s12 = int_to_ptr.vmem [resolvable:$true] %s145_s12 }
  0x28   :  { %v43_v5 = vld [vmem:[#allocation2] sm:$0xff]  ;;  %v182_v6 = vpack.c.bf16 %v48_v4, %v47_v2  ;;  %v44_v7 = vld [vmem:[#allocation2 + $0x8] sm:$0xff]  ;;  %s235_s13 = scalar_lea.vmem %s146_s12, 256  ;;  %p240_p3 = scmp.lt.s32.totalorder %s146_s12, %s146_s12 }
  0x29   :  { %175 = vmatprep.mubr.msk.f32.mxu0 %vm56_vm0, %v43_v5  ;;  %179 = vmatprep.subr.bf16.mxu0 %v178_v3  ;;  %v158_v8 = vld [vmem:[%s342_s2] ss:$0 sm:$0xff]  ;;  %p236_p2 = scmp.ne.s32.totalorder %s146_s12, %s235_s13  ;;  %p241_p4 = scmp.lt.s32.totalorder %s235_s13, %s235_s13 }
  0x2a   :  { %181 = vmatpush3.bf16.msra.mxu0 %v178_v3 }
  0x2b   :  { %183 = vmatprep.subr.bf16.mxu0 %v182_v6  ;;  %p242_p5 = por %p241_p4, %p240_p3 }
  0x2d   :  { %p243_p6 = pnand %p242_p5, %p236_p2 }
  0x2e   :  { %185 = vmatpush3.bf16.msra.mxu0 %v182_v6 }
  0x31   :  { %176 = vmatmul.mubr.msk.f32.vlgmr.msra.gmra.mrb[0].mxu0 %vm56_vm0, %v44_v7 }
 0x104   :  { %v177_v9 = vpop.f32.mrb[0].mxu0 }
 0x105   :  { %v135_v10 = vadd.f32 %v177_v9, %v158_v8  ;;  %v129_v11 = vpop.f32.mrb[1].mxu0 }
 0x106   :  { %v130_v12 = vadd.f32 %v158_v8, %v129_v11 }
 0x107   :  { %139 = vst.msk [vmem:[#allocation7 + $0x8] sm:$0xff] %vm56_vm0, %v135_v10 }
 0x108   :  { %138 = vst.msk [vmem:[#allocation7] sm:$0xff] %vm56_vm0, %v130_v12 }
 0x109   :  { %246 = shalt.err (!%p243_p6)
}
 0x10a   :  { %s247_s15 = scalar_lea.hbm %s343_s3, 256 }
 0x10b   :  { %p248_p7 = scmp.ne.s32.totalorder %s343_s3, %s247_s15  ;;  %p251_p8 = scmp.lt.u32.totalorder %s247_s15, %s343_s3 }
 0x10d   :  { %p253_p9 = pnand %p251_p8, %p248_p7 }
 0x10f   :  { %256 = shalt.err (!%p253_p9)
}
 0x110   :  { %151 = dma.vmem_to_hbm [thread:$0]  %s146_s12, 256, %s343_s3, [#allocation4], %s264_s22, %s264_s22, %s265_s23  }
 0x111   :  { %261 = dma.done.wait [#allocation4], 256  }
 0x112   :  { %262 = vsyncadd [#allocation4], 4294967040 }
 0x113   :  { %155 = vsyncpa [#allocation3], 1 }
 0x114   :  { %156 = vsyncpa [#allocation6], 1 }
 0x115   :  { %157 = vsyncpa [#allocation4], 1 }

</bundles_post_ra>
